<compile_context>
chip_gen: v6e
topology: v6e:2x2x1
jax: 0.10.0
libtpu: 0.0.40
codegen_flags: <defaults>
</compile_context>

<pallas_src>
import jax
import jax.numpy as jnp
import numpy as np
from jax.experimental import pallas as pl
from jax.experimental.pallas import tpu as pltpu


LANE = 128
SUBLANE = 8


def _round_up(n, m):
    return -(-n // m) * m


# ----------------------------- Pallas kernel ---------------------------------
def c_hntm_forward_kernel(
    x_ref, eps_ref,
    e0_w, e0_b, e1_w, e1_b,          # encoder linears (padded, bf16 weights / f32 biases)
    mulv_w, mulv_b,                  # fused fc_mu | fc_logvar
    d0_w, d0_b, d1_w, d1_b, d2_w, d2_b,   # decoder linears
    recon_ref, mulv_ref,
):
    Lp = eps_ref.shape[-1]           # padded latent width (multiple of 128)

    xb = x_ref[...]                                                      # bf16 (TB, Vp)

    # ---- encode ----
    h = jnp.dot(xb, e0_w[...], preferred_element_type=jnp.float32) + e0_b[...]
    h = jnp.maximum(h, 0.0).astype(jnp.bfloat16)
    h = jnp.dot(h, e1_w[...], preferred_element_type=jnp.float32) + e1_b[...]
    h = jnp.maximum(h, 0.0).astype(jnp.bfloat16)

    # fused mu|logvar:  (TB, 2*Lp), cols [0:Lp] -> mu-padded, [Lp:2Lp] -> logvar-padded
    mulv = jnp.dot(h, mulv_w[...], preferred_element_type=jnp.float32) + mulv_b[...]
    mu_p = mulv[:, :Lp]
    lv_p = mulv[:, Lp:]

    # ---- reparameterize:  z = mu + eps * exp(logvar / 2) ----
    # (padded lanes: mu=0, logvar=0 -> exp=1, eps=0 -> z=0, so the decoder is unaffected)
    z = mu_p + eps_ref[...] * jnp.exp(lv_p * 0.5)
    zb = z.astype(jnp.bfloat16)

    # ---- decode ----
    hd = jnp.dot(zb, d0_w[...], preferred_element_type=jnp.float32) + d0_b[...]
    hd = jnp.maximum(hd, 0.0).astype(jnp.bfloat16)
    hd = jnp.dot(hd, d1_w[...], preferred_element_type=jnp.float32) + d1_b[...]
    hd = jnp.maximum(hd, 0.0).astype(jnp.bfloat16)
    recon = jnp.dot(hd, d2_w[...], preferred_element_type=jnp.float32) + d2_b[...]

    recon_ref[...] = recon
    mulv_ref[...] = mulv


# ------------------------------- wrapper --------------------------------------
def c_hntm_forward(x, eps, params):
    """params: dict with transposed weights (in,out) and (1,out) biases (unpadded, f32)."""
    B, V = x.shape
    n_leaf = eps.shape[1]

    # ---- padded dims (lane width) ----
    Vp = _round_up(V, LANE)
    H1p = _round_up(params["e0_w"].shape[1], LANE)
    H2p = _round_up(params["e1_w"].shape[1], LANE)
    Lp = _round_up(n_leaf, LANE)
    D1p = _round_up(params["d0_w"].shape[1], LANE)
    D2p = _round_up(params["d1_w"].shape[1], LANE)

    # ---- batch tiling: large tiles at large B (MXU M-dim occupancy + amortized step cost) ----
    TB = 256 if B >= 256 else _round_up(B, SUBLANE)
    Bp = _round_up(B, TB)
    grid = (Bp // TB,)

    # ---- pad & cast call-time tensors ----
    xp = jnp.pad(x, ((0, Bp - B), (0, Vp - V))).astype(jnp.bfloat16)
    epsp = jnp.pad(eps, ((0, Bp - B), (0, Lp - n_leaf))).astype(jnp.float32)

    def padw(w, r, c):
        return jnp.pad(w, ((0, r - w.shape[0]), (0, c - w.shape[1]))).astype(jnp.bfloat16)

    def padb(b, c):
        return jnp.pad(b, ((0, 0), (0, c - b.shape[1]))).astype(jnp.float32)

    e0_w = padw(params["e0_w"], Vp, H1p);  e0_b = padb(params["e0_b"], H1p)
    e1_w = padw(params["e1_w"], H1p, H2p); e1_b = padb(params["e1_b"], H2p)

    # fused fc_mu | fc_logvar weight/bias, each half lane-padded to Lp
    mulv_w = jnp.zeros((H2p, 2 * Lp), jnp.float32)
    mulv_w = mulv_w.at[:params["mu_w"].shape[0], :n_leaf].set(params["mu_w"])
    mulv_w = mulv_w.at[:params["lv_w"].shape[0], Lp:Lp + n_leaf].set(params["lv_w"])
    mulv_w = mulv_w.astype(jnp.bfloat16)
    mulv_b = jnp.zeros((1, 2 * Lp), jnp.float32)
    mulv_b = mulv_b.at[:, :n_leaf].set(params["mu_b"])
    mulv_b = mulv_b.at[:, Lp:Lp + n_leaf].set(params["lv_b"])

    d0_w = padw(params["d0_w"], Lp, D1p);  d0_b = padb(params["d0_b"], D1p)
    d1_w = padw(params["d1_w"], D1p, D2p); d1_b = padb(params["d1_b"], D2p)
    d2_w = padw(params["d2_w"], D2p, Vp);  d2_b = padb(params["d2_b"], Vp)

    weight_args = (e0_w, e0_b, e1_w, e1_b, mulv_w, mulv_b,
                   d0_w, d0_b, d1_w, d1_b, d2_w, d2_b)

    # ---- BlockSpecs: row-tiled activations, VMEM-resident weights ----
    row_spec = lambda cols: pl.BlockSpec((TB, cols), lambda i: (i, 0))
    resident = lambda a: pl.BlockSpec(a.shape, lambda i: (0, 0))

    in_specs = [row_spec(Vp), row_spec(Lp)] + [resident(w) for w in weight_args]
    out_specs = (row_spec(Vp), row_spec(2 * Lp))
    out_shape = (
        jax.ShapeDtypeStruct((Bp, Vp), jnp.float32),
        jax.ShapeDtypeStruct((Bp, 2 * Lp), jnp.float32),
    )

    # ---- advisory cost estimate for the XLA scheduler ----
    flops = 2 * Bp * (Vp * H1p + H1p * H2p + H2p * (2 * Lp)
                      + Lp * D1p + D1p * D2p + D2p * Vp)
    bytes_accessed = (xp.size * xp.dtype.itemsize + epsp.size * epsp.dtype.itemsize
                      + sum(int(w.size) * w.dtype.itemsize for w in weight_args)
                      + Bp * Vp * 4 + Bp * 2 * Lp * 4)
    cost = pl.CostEstimate(flops=int(flops), transcendentals=int(Bp * Lp),
                           bytes_accessed=int(bytes_accessed))

    recon_p, mulv = pl.pallas_call(
        c_hntm_forward_kernel,
        grid=grid,
        in_specs=in_specs,
        out_specs=out_specs,
        out_shape=out_shape,
        compiler_params=pltpu.CompilerParams(dimension_semantics=("parallel",)),
        cost_estimate=cost,
    )(xp, epsp, *weight_args)

    recon = recon_p[:B, :V]
    mu = mulv[:B, :n_leaf]
    logvar = mulv[:B, Lp:Lp + n_leaf]
    return recon, mu, logvar


# --------------------------- pure-JAX reference --------------------------------
def c_hntm_forward_ref(x, eps, p):
    h = jax.nn.relu(x @ p["e0_w"] + p["e0_b"])
    h = jax.nn.relu(h @ p["e1_w"] + p["e1_b"])
    mu = h @ p["mu_w"] + p["mu_b"]
    logvar = h @ p["lv_w"] + p["lv_b"]
    z = mu + eps * jnp.exp(logvar * 0.5)
    hd = jax.nn.relu(z @ p["d0_w"] + p["d0_b"])
    hd = jax.nn.relu(hd @ p["d1_w"] + p["d1_b"])
    recon = hd @ p["d2_w"] + p["d2_b"]
    return recon, mu, logvar


# ------------------------------ parameter init ---------------------------------
def init_params(key, encode_dims, decode_dims):
    """Deterministic synthetic init. Weights stored transposed: (in_dim, out_dim)."""
    names_dims = [
        ("e0", encode_dims[0], encode_dims[1]),
        ("e1", encode_dims[1], encode_dims[2]),
        ("mu", encode_dims[-2], encode_dims[-1]),
        ("lv", encode_dims[-2], encode_dims[-1]),
        ("d0", decode_dims[0], decode_dims[1]),
        ("d1", decode_dims[1], decode_dims[2]),
        ("d2", decode_dims[2], decode_dims[3]),
    ]
    params = {}
    for name, din, dout in names_dims:
        key, kw, kb = jax.random.split(key, 3)
        scale = 1.0 / np.sqrt(din)
        params[f"{name}_w"] = jax.random.normal(kw, (din, dout), jnp.float32) * scale
        params[f"{name}_b"] = jax.random.normal(kb, (1, dout), jnp.float32) * scale
    return params


# ----------------------------------- main ---------------------------------------
if __name__ == "__main__":
    # Small configuration consistent with the module:
    #   vocab_size = 128, encode_dims = [128, 64, 32, 16] -> n_topic_leaf = 16
    #   decode_dims = [16, 32, 64, 128]
    vocab_size = 128
    encode_dims = [vocab_size, 64, 32, 16]
    decode_dims = [16, 32, 64, vocab_size]
    batch = 8

    key = jax.random.PRNGKey(0)
    key, kx, keps, kp = jax.random.split(key, 4)

    # bag-of-words-like non-negative input
    x = jax.nn.softmax(jax.random.normal(kx, (batch, vocab_size), jnp.float32), axis=-1)
    eps = jax.random.normal(keps, (batch, encode_dims[-1]), jnp.float32)
    params = init_params(kp, encode_dims, decode_dims)

    recon, mu, logvar = c_hntm_forward(x, eps, params)
    jax.block_until_ready((recon, mu, logvar))

    r_ref, mu_ref, lv_ref = c_hntm_forward_ref(x, eps, params)
    # bf16 matmul operands (f32 accumulation) -> slightly looser tolerance vs. the f32 reference
    np.testing.assert_allclose(np.asarray(recon), np.asarray(r_ref), rtol=2e-2, atol=2e-2)
    np.testing.assert_allclose(np.asarray(mu), np.asarray(mu_ref), rtol=2e-2, atol=2e-2)
    np.testing.assert_allclose(np.asarray(logvar), np.asarray(lv_ref), rtol=2e-2, atol=2e-2)

    print("KERNEL_OK")
</pallas_src>

<mosaic_0001>
module attributes {stable_mosaic.version = 11 : i64} {
  func.func @c_hntm_forward_kernel(%arg0: i32, %arg1: memref<8x128xbf16, #tpu.memory_space<vmem>>, %arg2: memref<8x128xf32, #tpu.memory_space<vmem>>, %arg3: memref<128x128xbf16, #tpu.memory_space<vmem>>, %arg4: memref<1x128xf32, #tpu.memory_space<vmem>>, %arg5: memref<128x128xbf16, #tpu.memory_space<vmem>>, %arg6: memref<1x128xf32, #tpu.memory_space<vmem>>, %arg7: memref<128x256xbf16, #tpu.memory_space<vmem>>, %arg8: memref<1x256xf32, #tpu.memory_space<vmem>>, %arg9: memref<128x128xbf16, #tpu.memory_space<vmem>>, %arg10: memref<1x128xf32, #tpu.memory_space<vmem>>, %arg11: memref<128x128xbf16, #tpu.memory_space<vmem>>, %arg12: memref<1x128xf32, #tpu.memory_space<vmem>>, %arg13: memref<128x128xbf16, #tpu.memory_space<vmem>>, %arg14: memref<1x128xf32, #tpu.memory_space<vmem>>, %arg15: memref<8x128xf32, #tpu.memory_space<vmem>>, %arg16: memref<8x256xf32, #tpu.memory_space<vmem>>) attributes {dimension_semantics = [#tpu.dimension_semantics<parallel>], iteration_bounds = array<i64: 1>, scalar_prefetch = 0 : i64, scratch_operands = 0 : i64, tpu.core_type = #tpu.core_type<tc>, window_params = [{transform_indices = @transform_0, window_bounds = array<i64: 8, 128>}, {transform_indices = @transform_1, window_bounds = array<i64: 8, 128>}, {pipeline_mode = #tpu.pipeline_mode<synchronous>, transform_indices = @transform_2, window_bounds = array<i64: 128, 128>}, {pipeline_mode = #tpu.pipeline_mode<synchronous>, transform_indices = @transform_3, window_bounds = array<i64: 1, 128>}, {pipeline_mode = #tpu.pipeline_mode<synchronous>, transform_indices = @transform_4, window_bounds = array<i64: 128, 128>}, {pipeline_mode = #tpu.pipeline_mode<synchronous>, transform_indices = @transform_5, window_bounds = array<i64: 1, 128>}, {pipeline_mode = #tpu.pipeline_mode<synchronous>, transform_indices = @transform_6, window_bounds = array<i64: 128, 256>}, {pipeline_mode = #tpu.pipeline_mode<synchronous>, transform_indices = @transform_7, window_bounds = array<i64: 1, 256>}, {pipeline_mode = #tpu.pipeline_mode<synchronous>, transform_indices = @transform_8, window_bounds = array<i64: 128, 128>}, {pipeline_mode = #tpu.pipeline_mode<synchronous>, transform_indices = @transform_9, window_bounds = array<i64: 1, 128>}, {pipeline_mode = #tpu.pipeline_mode<synchronous>, transform_indices = @transform_10, window_bounds = array<i64: 128, 128>}, {pipeline_mode = #tpu.pipeline_mode<synchronous>, transform_indices = @transform_11, window_bounds = array<i64: 1, 128>}, {pipeline_mode = #tpu.pipeline_mode<synchronous>, transform_indices = @transform_12, window_bounds = array<i64: 128, 128>}, {pipeline_mode = #tpu.pipeline_mode<synchronous>, transform_indices = @transform_13, window_bounds = array<i64: 1, 128>}, {transform_indices = @transform_14, window_bounds = array<i64: 8, 128>}, {transform_indices = @transform_15, window_bounds = array<i64: 8, 256>}]} {
    %c0 = arith.constant 0 : index
    %c0_0 = arith.constant 0 : index
    %0 = vector.load %arg1[%c0, %c0_0] : memref<8x128xbf16, #tpu.memory_space<vmem>>, vector<8x128xbf16>
    %c0_1 = arith.constant 0 : index
    %c0_2 = arith.constant 0 : index
    %1 = vector.load %arg3[%c0_1, %c0_2] : memref<128x128xbf16, #tpu.memory_space<vmem>>, vector<128x128xbf16>
    %cst = arith.constant dense<0.000000e+00> : vector<8x128xf32>
    %2 = tpu.matmul %0, %1, %cst {dimension_numbers = #tpu.dot_dimension_numbers<[1], [0], [0], [1], [0, 0, 1, 1], [], []>} : vector<8x128xbf16>, vector<128x128xbf16>, vector<8x128xf32> -> vector<8x128xf32>
    %c0_3 = arith.constant 0 : index
    %c0_4 = arith.constant 0 : index
    %3 = vector.load %arg4[%c0_3, %c0_4] : memref<1x128xf32, #tpu.memory_space<vmem>>, vector<1x128xf32>
    %4 = vector.broadcast %3 : vector<1x128xf32> to vector<8x128xf32>
    %5 = arith.addf %2, %4 : vector<8x128xf32>
    %cst_5 = arith.constant 0.000000e+00 : f32
    %6 = vector.broadcast %cst_5 : f32 to vector<8x128xf32>
    %7 = arith.maximumf %5, %6 : vector<8x128xf32>
    %8 = arith.truncf %7 : vector<8x128xf32> to vector<8x128xbf16>
    %c0_6 = arith.constant 0 : index
    %c0_7 = arith.constant 0 : index
    %9 = vector.load %arg5[%c0_6, %c0_7] : memref<128x128xbf16, #tpu.memory_space<vmem>>, vector<128x128xbf16>
    %cst_8 = arith.constant dense<0.000000e+00> : vector<8x128xf32>
    %10 = tpu.matmul %8, %9, %cst_8 {dimension_numbers = #tpu.dot_dimension_numbers<[1], [0], [0], [1], [0, 0, 1, 1], [], []>} : vector<8x128xbf16>, vector<128x128xbf16>, vector<8x128xf32> -> vector<8x128xf32>
    %c0_9 = arith.constant 0 : index
    %c0_10 = arith.constant 0 : index
    %11 = vector.load %arg6[%c0_9, %c0_10] : memref<1x128xf32, #tpu.memory_space<vmem>>, vector<1x128xf32>
    %12 = vector.broadcast %11 : vector<1x128xf32> to vector<8x128xf32>
    %13 = arith.addf %10, %12 : vector<8x128xf32>
    %cst_11 = arith.constant 0.000000e+00 : f32
    %14 = vector.broadcast %cst_11 : f32 to vector<8x128xf32>
    %15 = arith.maximumf %13, %14 : vector<8x128xf32>
    %16 = arith.truncf %15 : vector<8x128xf32> to vector<8x128xbf16>
    %c0_12 = arith.constant 0 : index
    %c0_13 = arith.constant 0 : index
    %17 = vector.load %arg7[%c0_12, %c0_13] : memref<128x256xbf16, #tpu.memory_space<vmem>>, vector<128x256xbf16>
    %cst_14 = arith.constant dense<0.000000e+00> : vector<8x256xf32>
    %18 = tpu.matmul %16, %17, %cst_14 {dimension_numbers = #tpu.dot_dimension_numbers<[1], [0], [0], [1], [0, 0, 1, 1], [], []>} : vector<8x128xbf16>, vector<128x256xbf16>, vector<8x256xf32> -> vector<8x256xf32>
    %c0_15 = arith.constant 0 : index
    %c0_16 = arith.constant 0 : index
    %19 = vector.load %arg8[%c0_15, %c0_16] : memref<1x256xf32, #tpu.memory_space<vmem>>, vector<1x256xf32>
    %20 = vector.broadcast %19 : vector<1x256xf32> to vector<8x256xf32>
    %21 = arith.addf %18, %20 : vector<8x256xf32>
    %22 = vector.extract_strided_slice %21 {offsets = [0, 0], sizes = [8, 128], strides = [1, 1]} : vector<8x256xf32> to vector<8x128xf32>
    %23 = vector.extract_strided_slice %21 {offsets = [0, 128], sizes = [8, 128], strides = [1, 1]} : vector<8x256xf32> to vector<8x128xf32>
    %c0_17 = arith.constant 0 : index
    %c0_18 = arith.constant 0 : index
    %24 = vector.load %arg2[%c0_17, %c0_18] : memref<8x128xf32, #tpu.memory_space<vmem>>, vector<8x128xf32>
    %cst_19 = arith.constant 5.000000e-01 : f32
    %25 = vector.broadcast %cst_19 : f32 to vector<8x128xf32>
    %26 = arith.mulf %23, %25 : vector<8x128xf32>
    %27 = math.exp %26 : vector<8x128xf32>
    %28 = arith.mulf %24, %27 : vector<8x128xf32>
    %29 = arith.addf %22, %28 : vector<8x128xf32>
    %30 = arith.truncf %29 : vector<8x128xf32> to vector<8x128xbf16>
    %c0_20 = arith.constant 0 : index
    %c0_21 = arith.constant 0 : index
    %31 = vector.load %arg9[%c0_20, %c0_21] : memref<128x128xbf16, #tpu.memory_space<vmem>>, vector<128x128xbf16>
    %cst_22 = arith.constant dense<0.000000e+00> : vector<8x128xf32>
    %32 = tpu.matmul %30, %31, %cst_22 {dimension_numbers = #tpu.dot_dimension_numbers<[1], [0], [0], [1], [0, 0, 1, 1], [], []>} : vector<8x128xbf16>, vector<128x128xbf16>, vector<8x128xf32> -> vector<8x128xf32>
    %c0_23 = arith.constant 0 : index
    %c0_24 = arith.constant 0 : index
    %33 = vector.load %arg10[%c0_23, %c0_24] : memref<1x128xf32, #tpu.memory_space<vmem>>, vector<1x128xf32>
    %34 = vector.broadcast %33 : vector<1x128xf32> to vector<8x128xf32>
    %35 = arith.addf %32, %34 : vector<8x128xf32>
    %cst_25 = arith.constant 0.000000e+00 : f32
    %36 = vector.broadcast %cst_25 : f32 to vector<8x128xf32>
    %37 = arith.maximumf %35, %36 : vector<8x128xf32>
    %38 = arith.truncf %37 : vector<8x128xf32> to vector<8x128xbf16>
    %c0_26 = arith.constant 0 : index
    %c0_27 = arith.constant 0 : index
    %39 = vector.load %arg11[%c0_26, %c0_27] : memref<128x128xbf16, #tpu.memory_space<vmem>>, vector<128x128xbf16>
    %cst_28 = arith.constant dense<0.000000e+00> : vector<8x128xf32>
    %40 = tpu.matmul %38, %39, %cst_28 {dimension_numbers = #tpu.dot_dimension_numbers<[1], [0], [0], [1], [0, 0, 1, 1], [], []>} : vector<8x128xbf16>, vector<128x128xbf16>, vector<8x128xf32> -> vector<8x128xf32>
    %c0_29 = arith.constant 0 : index
    %c0_30 = arith.constant 0 : index
    %41 = vector.load %arg12[%c0_29, %c0_30] : memref<1x128xf32, #tpu.memory_space<vmem>>, vector<1x128xf32>
    %42 = vector.broadcast %41 : vector<1x128xf32> to vector<8x128xf32>
    %43 = arith.addf %40, %42 : vector<8x128xf32>
    %cst_31 = arith.constant 0.000000e+00 : f32
    %44 = vector.broadcast %cst_31 : f32 to vector<8x128xf32>
    %45 = arith.maximumf %43, %44 : vector<8x128xf32>
    %46 = arith.truncf %45 : vector<8x128xf32> to vector<8x128xbf16>
    %c0_32 = arith.constant 0 : index
    %c0_33 = arith.constant 0 : index
    %47 = vector.load %arg13[%c0_32, %c0_33] : memref<128x128xbf16, #tpu.memory_space<vmem>>, vector<128x128xbf16>
    %cst_34 = arith.constant dense<0.000000e+00> : vector<8x128xf32>
    %48 = tpu.matmul %46, %47, %cst_34 {dimension_numbers = #tpu.dot_dimension_numbers<[1], [0], [0], [1], [0, 0, 1, 1], [], []>} : vector<8x128xbf16>, vector<128x128xbf16>, vector<8x128xf32> -> vector<8x128xf32>
    %c0_35 = arith.constant 0 : index
    %c0_36 = arith.constant 0 : index
    %49 = vector.load %arg14[%c0_35, %c0_36] : memref<1x128xf32, #tpu.memory_space<vmem>>, vector<1x128xf32>
    %50 = vector.broadcast %49 : vector<1x128xf32> to vector<8x128xf32>
    %51 = arith.addf %48, %50 : vector<8x128xf32>
    %c0_37 = arith.constant 0 : index
    %c0_38 = arith.constant 0 : index
    %52 = vector.load %arg15[%c0_37, %c0_38] : memref<8x128xf32, #tpu.memory_space<vmem>>, vector<8x128xf32>
    tpu.vector_store %arg15[%c0_37, %c0_38], %51 {strides = array<i32>} : memref<8x128xf32, #tpu.memory_space<vmem>>, vector<8x128xf32>,
    %c0_39 = arith.constant 0 : index
    %c0_40 = arith.constant 0 : index
    %53 = vector.load %arg16[%c0_39, %c0_40] : memref<8x256xf32, #tpu.memory_space<vmem>>, vector<8x256xf32>
    tpu.vector_store %arg16[%c0_39, %c0_40], %21 {strides = array<i32>} : memref<8x256xf32, #tpu.memory_space<vmem>>, vector<8x256xf32>,
    return
  }
  func.func @transform_0(%arg0: i32) -> (i32, i32) {
    %c0_i32 = arith.constant 0 : i32
    %c0_i32_0 = arith.constant 0 : i32
    return %arg0, %c0_i32 : i32, i32
  }
  func.func @transform_1(%arg0: i32) -> (i32, i32) {
    %c0_i32 = arith.constant 0 : i32
    %c0_i32_0 = arith.constant 0 : i32
    return %arg0, %c0_i32 : i32, i32
  }
  func.func @transform_2(%arg0: i32) -> (i32, i32) {
    %c0_i32 = arith.constant 0 : i32
    %c0_i32_0 = arith.constant 0 : i32
    %c0_i32_1 = arith.constant 0 : i32
    return %c0_i32, %c0_i32_0 : i32, i32
  }
  func.func @transform_3(%arg0: i32) -> (i32, i32) {
    %c0_i32 = arith.constant 0 : i32
    %c0_i32_0 = arith.constant 0 : i32
    %c0_i32_1 = arith.constant 0 : i32
    return %c0_i32, %c0_i32_0 : i32, i32
  }
  func.func @transform_4(%arg0: i32) -> (i32, i32) {
    %c0_i32 = arith.constant 0 : i32
    %c0_i32_0 = arith.constant 0 : i32
    %c0_i32_1 = arith.constant 0 : i32
    return %c0_i32, %c0_i32_0 : i32, i32
  }
  func.func @transform_5(%arg0: i32) -> (i32, i32) {
    %c0_i32 = arith.constant 0 : i32
    %c0_i32_0 = arith.constant 0 : i32
    %c0_i32_1 = arith.constant 0 : i32
    return %c0_i32, %c0_i32_0 : i32, i32
  }
  func.func @transform_6(%arg0: i32) -> (i32, i32) {
    %c0_i32 = arith.constant 0 : i32
    %c0_i32_0 = arith.constant 0 : i32
    %c0_i32_1 = arith.constant 0 : i32
    return %c0_i32, %c0_i32_0 : i32, i32
  }
  func.func @transform_7(%arg0: i32) -> (i32, i32) {
    %c0_i32 = arith.constant 0 : i32
    %c0_i32_0 = arith.constant 0 : i32
    %c0_i32_1 = arith.constant 0 : i32
    return %c0_i32, %c0_i32_0 : i32, i32
  }
  func.func @transform_8(%arg0: i32) -> (i32, i32) {
    %c0_i32 = arith.constant 0 : i32
    %c0_i32_0 = arith.constant 0 : i32
    %c0_i32_1 = arith.constant 0 : i32
    return %c0_i32, %c0_i32_0 : i32, i32
  }
  func.func @transform_9(%arg0: i32) -> (i32, i32) {
    %c0_i32 = arith.constant 0 : i32
    %c0_i32_0 = arith.constant 0 : i32
    %c0_i32_1 = arith.constant 0 : i32
    return %c0_i32, %c0_i32_0 : i32, i32
  }
  func.func @transform_10(%arg0: i32) -> (i32, i32) {
    %c0_i32 = arith.constant 0 : i32
    %c0_i32_0 = arith.constant 0 : i32
    %c0_i32_1 = arith.constant 0 : i32
    return %c0_i32, %c0_i32_0 : i32, i32
  }
  func.func @transform_11(%arg0: i32) -> (i32, i32) {
    %c0_i32 = arith.constant 0 : i32
    %c0_i32_0 = arith.constant 0 : i32
    %c0_i32_1 = arith.constant 0 : i32
    return %c0_i32, %c0_i32_0 : i32, i32
  }
  func.func @transform_12(%arg0: i32) -> (i32, i32) {
    %c0_i32 = arith.constant 0 : i32
    %c0_i32_0 = arith.constant 0 : i32
    %c0_i32_1 = arith.constant 0 : i32
    return %c0_i32, %c0_i32_0 : i32, i32
  }
  func.func @transform_13(%arg0: i32) -> (i32, i32) {
    %c0_i32 = arith.constant 0 : i32
    %c0_i32_0 = arith.constant 0 : i32
    %c0_i32_1 = arith.constant 0 : i32
    return %c0_i32, %c0_i32_0 : i32, i32
  }
  func.func @transform_14(%arg0: i32) -> (i32, i32) {
    %c0_i32 = arith.constant 0 : i32
    %c0_i32_0 = arith.constant 0 : i32
    return %arg0, %c0_i32 : i32, i32
  }
  func.func @transform_15(%arg0: i32) -> (i32, i32) {
    %c0_i32 = arith.constant 0 : i32
    %c0_i32_0 = arith.constant 0 : i32
    return %arg0, %c0_i32 : i32, i32
  }
}

</mosaic_0001>

<bundles_post_ra>
// kernel: tpu_custom_call.1
= control target key start
LH: loop header
LB: loop body
LE: loop exit
PB: predicated region body
PF: predicated region fallthrough
CT: control target
= control target key end

     0   :  { %21 = vsyncpa [#allocation3], 0  ;;  %s1626_s0 = inlined_call_operand.hbm [shape: bf16[8,128], index: 0, kind: input, shape index: {}]   ;;  %s1627_s1 = inlined_call_operand.hbm [shape: f32[8,128], index: 1, kind: input, shape index: {}]   ;;  %s1628_s2 = inlined_call_operand.hbm [shape: bf16[128,128], index: 2, kind: input, shape index: {}]   ;;  %s1629_s3 = inlined_call_operand.vmem [shape: f32[1,128], index: 3, kind: input, shape index: {}]   ;;  %s1630_s4 = inlined_call_operand.hbm [shape: bf16[128,128], index: 4, kind: input, shape index: {}]   ;;  %s1631_s5 = inlined_call_operand.vmem [shape: f32[1,128], index: 5, kind: input, shape index: {}]   ;;  %s1632_s6 = inlined_call_operand.hbm [shape: bf16[128,256], index: 6, kind: input, shape index: {}]   ;;  %s1633_s7 = inlined_call_operand.vmem [shape: f32[1,256], index: 7, kind: input, shape index: {}]   ;;  %s1634_s8 = inlined_call_operand.hbm [shape: bf16[128,128], index: 8, kind: input, shape index: {}]   ;;  %s1635_s9 = inlined_call_operand.vmem [shape: f32[1,128], index: 9, kind: input, shape index: {}]   ;;  %s1636_s10 = inlined_call_operand.hbm [shape: bf16[128,128], index: 10, kind: input, shape index: {}]   ;;  %s1637_s11 = inlined_call_operand.vmem [shape: f32[1,128], index: 11, kind: input, shape index: {}]   ;;  %s1638_s12 = inlined_call_operand.hbm [shape: bf16[128,128], index: 12, kind: input, shape index: {}]   ;;  %s1639_s13 = inlined_call_operand.vmem [shape: f32[1,128], index: 13, kind: input, shape index: {}]   ;;  %s1640_s14 = inlined_call_operand.hbm [shape: f32[8,128], index: 14, kind: output, shape index: {0}]   ;;  %s1641_s15 = inlined_call_operand.hbm [shape: f32[8,256], index: 15, kind: output, shape index: {1}]  }
   0x1   :  { %22 = vsyncpa [#allocation6], 0 }
   0x2   :  { %23 = vsyncpa [#allocation9], 0 }
   0x3   :  { %24 = vsyncpa [#allocation12], 0 }
   0x4   :  { %25 = vsyncpa [#allocation15], 0 }
   0x5   :  { %26 = vsyncpa [#allocation4], 0 }
   0x6   :  { %27 = vsyncpa [#allocation18], 0  ;;  %s1416_s18 = smov [#allocation5]  }
   0x7   :  { %s44_s19 = sshll.u32 %s1416_s18, 4  ;;  %s45_s19 = int_to_ptr.vmem [resolvable:$true] %s44_s19 }
   0x8   :  { %s1210_s20 = scalar_lea.vmem %s45_s19, 128  ;;  %p1215_p1 = scmp.lt.s32.totalorder %s45_s19, %s45_s19 }
   0x9   :  { %p1211_p0 = scmp.ne.s32.totalorder %s45_s19, %s1210_s20  ;;  %p1216_p2 = scmp.lt.s32.totalorder %s1210_s20, %s1210_s20 }
   0xb   :  { %p1217_p3 = por %p1216_p2, %p1215_p1 }
   0xd   :  { %p1218_p4 = pnand %p1217_p3, %p1211_p0 }
   0xf   :  { %1221 = shalt.err (!%p1218_p4)
}
  0x10   :  { %47 = dma.hbm_to_vmem [thread:$0]  %s1627_s1, 128, %s45_s19, [#allocation6]  }
  0x11   :  { %s1417_s23 = smov [#allocation8]   ;;  %s1418_s25 = smov [#allocation11]  }
  0x12   :  { %s67_s24 = sshll.u32 %s1417_s23, 4  ;;  %s95_s26 = sshll.u32 %s1418_s25, 4  ;;  %s68_s24 = int_to_ptr.vmem [resolvable:$true] %s67_s24  ;;  %s96_s26 = int_to_ptr.vmem [resolvable:$true] %s95_s26 }
  0x13   :  { %s1230_s27 = scalar_lea.vmem %s68_s24, 1024  ;;  %p1235_p6 = scmp.lt.s32.totalorder %s68_s24, %s68_s24 }
  0x14   :  { %p1231_p5 = scmp.ne.s32.totalorder %s68_s24, %s1230_s27  ;;  %p1236_p7 = scmp.lt.s32.totalorder %s1230_s27, %s1230_s27 }
  0x16   :  { %p1237_p8 = por %p1236_p7, %p1235_p6 }
  0x18   :  { %p1238_p9 = pnand %p1237_p8, %p1231_p5 }
  0x1a   :  { %1241 = shalt.err (!%p1238_p9)
}
  0x1b   :  { %s1419_s28 = smov 64   ;;  %s1420_s29 = smov 4  }
  0x1c   :  { %73 = dma.hbm_to_vmem [thread:$0]  %s1630_s4, 1024, %s68_s24, [#allocation9], %s1419_s28, %s1419_s28, %s1420_s29  }
  0x1d   :  { %s1250_s1 = scalar_lea.vmem %s96_s26, 1024  ;;  %p1255_p11 = scmp.lt.s32.totalorder %s96_s26, %s96_s26 }
  0x1e   :  { %p1251_p10 = scmp.ne.s32.totalorder %s96_s26, %s1250_s1  ;;  %p1256_p12 = scmp.lt.s32.totalorder %s1250_s1, %s1250_s1 }
  0x20   :  { %p1257_p13 = por %p1256_p12, %p1255_p11 }
  0x22   :  { %p1258_p0 = pnand %p1257_p13, %p1251_p10 }
  0x24   :  { %1261 = shalt.err (!%p1258_p0)
}
  0x25   :  { %101 = dma.hbm_to_vmem [thread:$0]  %s1634_s8, 1024, %s96_s26, [#allocation12], %s1419_s28, %s1419_s28, %s1420_s29  }
  0x26   :  { %s1421_s19 = smov [#allocation2]   ;;  %s1422_s21 = smov [#allocation7]  }
  0x27   :  { %s34_s20 = sshll.u32 %s1421_s19, 4  ;;  %s53_s4 = sshll.u32 %s1422_s21, 4  ;;  %s35_s20 = int_to_ptr.vmem [resolvable:$true] %s34_s20  ;;  %s54_s4 = int_to_ptr.vmem [resolvable:$true] %s53_s4 }
  0x28   :  { %s1270_s22 = scalar_lea.vmem %s35_s20, 64  ;;  %p1275_p2 = scmp.lt.s32.totalorder %s35_s20, %s35_s20 }
  0x29   :  { %p1271_p1 = scmp.ne.s32.totalorder %s35_s20, %s1270_s22  ;;  %p1276_p3 = scmp.lt.s32.totalorder %s1270_s22, %s1270_s22 }
  0x2b   :  { %p1277_p4 = por %p1276_p3, %p1275_p2 }
  0x2d   :  { %p1278_p5 = pnand %p1277_p4, %p1271_p1 }
  0x2f   :  { %1281 = shalt.err (!%p1278_p5)
}
  0x30   :  { %37 = dma.hbm_to_vmem [thread:$0]  %s1626_s0, 64, %s35_s20, [#allocation3]  }
  0x31   :  { %s1290_s25 = scalar_lea.vmem %s54_s4, 1024  ;;  %p1295_p7 = scmp.lt.s32.totalorder %s54_s4, %s54_s4 }
  0x32   :  { %p1291_p6 = scmp.ne.s32.totalorder %s54_s4, %s1290_s25  ;;  %p1296_p8 = scmp.lt.s32.totalorder %s1290_s25, %s1290_s25 }
  0x34   :  { %p1297_p9 = por %p1296_p8, %p1295_p7 }
  0x36   :  { %p1298_p10 = pnand %p1297_p9, %p1291_p6 }
  0x38   :  { %1301 = shalt.err (!%p1298_p10)
}
  0x39   :  { %59 = dma.hbm_to_vmem [thread:$0]  %s1628_s2, 1024, %s54_s4, [#allocation6], %s1419_s28, %s1419_s28, %s1420_s29  }
  0x3a   :  { %s1423_s27 = smov [#allocation10]  }
  0x3b   :  { %s81_s30 = sshll.u32 %s1423_s27, 4  ;;  %s82_s30 = int_to_ptr.vmem [resolvable:$true] %s81_s30 }
  0x3c   :  { %s1310_s16 = scalar_lea.vmem %s82_s30, 2048  ;;  %p1315_p12 = scmp.lt.s32.totalorder %s82_s30, %s82_s30 }
  0x3d   :  { %p1311_p11 = scmp.ne.s32.totalorder %s82_s30, %s1310_s16  ;;  %p1316_p13 = scmp.lt.s32.totalorder %s1310_s16, %s1310_s16 }
  0x3f   :  { %p1317_p0 = por %p1316_p13, %p1315_p12 }
  0x41   :  { %p1318_p1 = pnand %p1317_p0, %p1311_p11 }
  0x43   :  { %1321 = shalt.err (!%p1318_p1)
}
  0x44   :  { %s1424_s0 = smov 128   ;;  %s1425_s1 = smov 8  }
  0x45   :  { %87 = dma.hbm_to_vmem [thread:$0]  %s1632_s6, 2048, %s82_s30, [#allocation9], %s1424_s0, %s1424_s0, %s1425_s1  }
  0x46   :  { %s1426_s19 = smov [#allocation13]   ;;  %s1427_s21 = smov [#allocation14]  }
  0x47   :  { %s109_s20 = sshll.u32 %s1426_s19, 4  ;;  %s123_s2 = sshll.u32 %s1427_s21, 4  ;;  %s110_s20 = int_to_ptr.vmem [resolvable:$true] %s109_s20  ;;  %s124_s2 = int_to_ptr.vmem [resolvable:$true] %s123_s2 }
  0x48   :  { %s1330_s4 = scalar_lea.vmem %s110_s20, 1024  ;;  %p1335_p3 = scmp.lt.s32.totalorder %s110_s20, %s110_s20 }
  0x49   :  { %p1331_p2 = scmp.ne.s32.totalorder %s110_s20, %s1330_s4  ;;  %p1336_p4 = scmp.lt.s32.totalorder %s1330_s4, %s1330_s4 }
  0x4b   :  { %p1337_p5 = por %p1336_p4, %p1335_p3 }
  0x4d   :  { %p1338_p6 = pnand %p1337_p5, %p1331_p2 }
  0x4f   :  { %1341 = shalt.err (!%p1338_p6)
}
  0x50   :  { %115 = dma.hbm_to_vmem [thread:$0]  %s1636_s10, 1024, %s110_s20, [#allocation12], %s1419_s28, %s1419_s28, %s1420_s29  }
  0x51   :  { %s1350_s6 = scalar_lea.vmem %s124_s2, 1024  ;;  %p1355_p8 = scmp.lt.s32.totalorder %s124_s2, %s124_s2 }
  0x52   :  { %p1351_p7 = scmp.ne.s32.totalorder %s124_s2, %s1350_s6  ;;  %p1356_p9 = scmp.lt.s32.totalorder %s1350_s6, %s1350_s6 }
  0x54   :  { %p1357_p10 = por %p1356_p9, %p1355_p8 }
  0x56   :  { %p1358_p11 = pnand %p1357_p10, %p1351_p7 }
  0x58   :  { %1361 = shalt.err (!%p1358_p11)
}
  0x59   :  { %129 = dma.hbm_to_vmem [thread:$0]  %s1638_s12, 1024, %s124_s2, [#allocation15], %s1419_s28, %s1419_s28, %s1420_s29  }
  0x5a   :  { %1402 = dma.done.wait [#allocation3], 64  }
  0x5b   :  { %1403 = vsyncadd [#allocation3], 4294967232 }
  0x5c   :  { %1404 = dma.done.wait [#allocation6], 1152  }
  0x5d   :  { %1405 = vsyncadd [#allocation6], 4294966144 }
  0x5e   :  { %1406 = dma.done.wait [#allocation9], 3072  }
  0x5f   :  { %1407 = vsyncadd [#allocation9], 4294964224 }
  0x60   :  { %1408 = dma.done.wait [#allocation12], 2048  }
  0x61   :  { %1409 = vsyncadd [#allocation12], 4294965248 }
  0x62   :  { %1410 = dma.done.wait [#allocation15], 1024  }
  0x63   :  { %1411 = vsyncadd [#allocation15], 4294966272  ;;  %v1428_v0 = vmov 0.0   ;;  %vm1429_vm0 = vmmov 0   ;;  %v1136_v1 = vld [vmem:[#allocation7 + $0x38] sm:$0xff]   ;;  %v1137_v2 = vld [vmem:[#allocation7 + $0x30] sm:$0xff]  }
  0x64   :  { %1019 = vmatprep.subr.bf16.mxu0 %v1428_v0  ;;  %1035 = vmatprep.mubr.msk.bf16.mxu0 %vm1429_vm0, %v1428_v0  ;;  %v1138_v3 = vld [vmem:[#allocation7 + $0x28] sm:$0xff]   ;;  %v1144_v4 = vld [vmem:[#allocation8 + $0x38] sm:$0xff]   ;;  %v1139_v5 = vld [vmem:[#allocation7 + $0x20] sm:$0xff]   ;;  %v1430_v42 = vmov 0  }
  0x65   :  { %1039 = vmatprep.subr.bf16.mxu1 %v1428_v0  ;;  %1055 = vmatprep.mubr.msk.bf16.mxu1 %vm1429_vm0, %v1428_v0  ;;  %v1145_v6 = vld [vmem:[#allocation8 + $0x30] sm:$0xff]   ;;  %v1140_v7 = vld [vmem:[#allocation7 + $0x18] sm:$0xff]   ;;  %v1146_v8 = vld [vmem:[#allocation8 + $0x28] sm:$0xff]  }
  0x66   :  { %1020 = vmatpush3.bf16.msra.mxu0 %v1136_v1  ;;  %1040 = vmatpush3.bf16.msra.mxu1 %v1144_v4  ;;  %v1141_v9 = vld [vmem:[#allocation7 + $0x10] sm:$0xff]   ;;  %v1147_v10 = vld [vmem:[#allocation8 + $0x20] sm:$0xff]   ;;  %v1142_v11 = vld [vmem:[#allocation7 + $0x8] sm:$0xff]  }
  0x67   :  { %1021 = vmatprep.subr.bf16.mxu0 %v1428_v0  ;;  %1041 = vmatprep.subr.bf16.mxu1 %v1428_v0  ;;  %v1148_v12 = vld [vmem:[#allocation8 + $0x18] sm:$0xff]   ;;  %v1143_v13 = vld [vmem:[#allocation7] sm:$0xff]   ;;  %v1149_v14 = vld [vmem:[#allocation8 + $0x10] sm:$0xff]  }
  0x68   :  { %v157_v15 = vld [vmem:[#allocation2] sm:$0xf]  ;;  %v1150_v16 = vld [vmem:[#allocation8 + $0x8] sm:$0xff]   ;;  %v1151_v17 = vld [vmem:[#allocation8] sm:$0xff]  }
  0x69   :  { %v1152_v18 = vld [vmem:[#allocation10 + $0x70] ss:$8 sps:$4 sm:$0xff]   ;;  %v1154_v19 = vld [vmem:[#allocation10 + $0x74] ss:$8 sps:$4 sm:$0xff]   ;;  %v1157_v20 = vld [vmem:[#allocation10 + $0x64] ss:$8 sps:$4 sm:$0xff]  }
  0x6a   :  { %1022 = vmatpush3.bf16.msra.mxu0 %v1137_v2  ;;  %1042 = vmatpush3.bf16.msra.mxu1 %v1145_v6  ;;  %v1155_v21 = vld [vmem:[#allocation10 + $0x60] ss:$8 sps:$4 sm:$0xff]   ;;  %v1160_v22 = vld [vmem:[#allocation10 + $0x54] ss:$8 sps:$4 sm:$0xff]   ;;  %v1158_v23 = vld [vmem:[#allocation10 + $0x50] ss:$8 sps:$4 sm:$0xff]   ;;  %v402_v2 = vlaneseq }
  0x6b   :  { %1023 = vmatprep.subr.bf16.mxu0 %v1428_v0  ;;  %1043 = vmatprep.subr.bf16.mxu1 %v1428_v0  ;;  %v1163_v24 = vld [vmem:[#allocation10 + $0x44] ss:$8 sps:$4 sm:$0xff]   ;;  %v1161_v25 = vld [vmem:[#allocation10 + $0x40] ss:$8 sps:$4 sm:$0xff]   ;;  %v1166_v26 = vld [vmem:[#allocation10 + $0x34] ss:$8 sps:$4 sm:$0xff]  }
  0x6c   :  { %v1164_v27 = vld [vmem:[#allocation10 + $0x30] ss:$8 sps:$4 sm:$0xff]   ;;  %v1169_v28 = vld [vmem:[#allocation10 + $0x24] ss:$8 sps:$4 sm:$0xff]   ;;  %v1167_v29 = vld [vmem:[#allocation10 + $0x20] ss:$8 sps:$4 sm:$0xff]  }
  0x6d   :  { %v1172_v30 = vld [vmem:[#allocation10 + $0x14] ss:$8 sps:$4 sm:$0xff]   ;;  %v1170_v31 = vld [vmem:[#allocation10 + $0x10] ss:$8 sps:$4 sm:$0xff]   ;;  %v1175_v40 = vld [vmem:[#allocation10 + $0x4] ss:$8 sps:$4 sm:$0xff]  }
  0x6e   :  { %1024 = vmatpush3.bf16.msra.mxu0 %v1138_v3  ;;  %1044 = vmatpush3.bf16.msra.mxu1 %v1146_v8  ;;  %v913_v32 = vld [vmem:[%s1629_s3] ss:$0 sm:$0xff]  ;;  %v1173_v41 = vld [vmem:[#allocation10] ss:$8 sps:$4 sm:$0xff]   ;;  %v1176_v43 = vld [vmem:[#allocation11 + $0x38] sm:$0xff]   ;;  %v403_v3 = vshrl.u32 %v402_v2, 7 }
  0x6f   :  { %1025 = vmatprep.subr.bf16.mxu0 %v1428_v0  ;;  %1045 = vmatprep.subr.bf16.mxu1 %v1428_v0  ;;  %v922_v44 = vld [vmem:[%s1631_s5] ss:$0 sm:$0xff]  ;;  %v1178_v53 = vld [vmem:[#allocation11 + $0x28] sm:$0xff]   ;;  %v1179_v54 = vld [vmem:[#allocation11 + $0x20] sm:$0xff]  }
  0x70   :  { %v1177_v52 = vld [vmem:[#allocation11 + $0x30] sm:$0xff]   ;;  %v1180_v55 = vld [vmem:[#allocation11 + $0x18] sm:$0xff]   ;;  %v1182_v57 = vld [vmem:[#allocation11 + $0x8] sm:$0xff]   ;;  %v404_v4 = vsub.s32 0, %v403_v3  ;;  %v408_v6 = vsub.s32 1, %v403_v3 }
  0x71   :  { %v1181_v56 = vld [vmem:[#allocation11 + $0x10] sm:$0xff]   ;;  %v1183_v58 = vld [vmem:[#allocation11] sm:$0xff]   ;;  %v1184_v59 = vld [vmem:[#allocation13 + $0x38] sm:$0xff]  }
  0x72   :  { %1026 = vmatpush3.bf16.msra.mxu0 %v1139_v5  ;;  %1046 = vmatpush3.bf16.msra.mxu1 %v1147_v10  ;;  %v1185_v60 = vld [vmem:[#allocation13 + $0x30] sm:$0xff]   ;;  %v1186_v61 = vld [vmem:[#allocation13 + $0x28] sm:$0xff]   ;;  %v1187_v62 = vld [vmem:[#allocation13 + $0x20] sm:$0xff]  }
  0x73   :  { %1027 = vmatprep.subr.bf16.mxu0 %v1428_v0  ;;  %1047 = vmatprep.subr.bf16.mxu1 %v1428_v0  ;;  %v1188_v63 = vld [vmem:[#allocation13 + $0x18] sm:$0xff]   ;;  %v1189_v1 = vld [vmem:[#allocation13 + $0x10] sm:$0xff]  }
  0x74   :  { %v400_v5 = vld [vmem:[%s1633_s7] sm:$0x3] }
  0x75   :  { %v409_v8 = vrot.slane %v400_v5, %v408_v6 }
  0x76   :  { %1028 = vmatpush3.bf16.msra.mxu0 %v1140_v7  ;;  %1048 = vmatpush3.bf16.msra.mxu1 %v1148_v12  ;;  %v405_v7 = vrot.slane %v400_v5, %v404_v4 }
  0x77   :  { %1029 = vmatprep.subr.bf16.mxu0 %v1428_v0  ;;  %1049 = vmatprep.subr.bf16.mxu1 %v1428_v0 }
  0x7a   :  { %1030 = vmatpush3.bf16.msra.mxu0 %v1141_v9  ;;  %1050 = vmatpush3.bf16.msra.mxu1 %v1149_v14 }
  0x7b   :  { %1031 = vmatprep.subr.bf16.mxu0 %v1428_v0  ;;  %1051 = vmatprep.subr.bf16.mxu1 %v1428_v0 }
  0x7e   :  { %1032 = vmatpush3.bf16.msra.mxu0 %v1142_v11  ;;  %1052 = vmatpush3.bf16.msra.mxu1 %v1150_v16 }
  0x7f   :  { %1033 = vmatprep.subr.bf16.mxu0 %v1428_v0  ;;  %1053 = vmatprep.subr.bf16.mxu1 %v1428_v0 }
  0x82   :  { %1034 = vmatpush3.bf16.msra.mxu0 %v1143_v13  ;;  %1054 = vmatpush3.bf16.msra.mxu1 %v1151_v17  ;;  %v533_v17 = vld [vmem:[#allocation5] sm:$0xff] }
  0x83   :  { %1059 = vmatprep.subr.bf16.mxu1 %v1428_v0  ;;  %492 = vmatprep.subr.bf16.mxu0 %v1154_v19 }
  0x85   :  { %1036 = vmatmul.mubr.bf16.vlgmr.msra.gmra.mxu0 %v157_v15 }
  0x86   :  { %493 = vmatpush1.bf16.msra.mxu0 %v1152_v18  ;;  %524 = vmatprep.mubr.bf16.mxu0 %v1430_v42 }
  0x87   :  { %494 = vmatprep.subr.bf16.mxu0 %v1157_v20 }
  0x8a   :  { %495 = vmatpush1.bf16.msra.mxu0 %v1155_v21 }
  0x8b   :  { %496 = vmatprep.subr.bf16.mxu0 %v1160_v22  ;;  %v1190_v22 = vld [vmem:[#allocation13 + $0x8] sm:$0xff]  }
  0x8e   :  { %497 = vmatpush1.bf16.msra.mxu0 %v1158_v23  ;;  %v1191_v23 = vld [vmem:[#allocation13] sm:$0xff]  }
  0x8f   :  { %498 = vmatprep.subr.bf16.mxu0 %v1163_v24  ;;  %v1192_v24 = vld [vmem:[#allocation14 + $0x38] sm:$0xff]  }
  0x92   :  { %499 = vmatpush1.bf16.msra.mxu0 %v1161_v25  ;;  %v1193_v25 = vld [vmem:[#allocation14 + $0x30] sm:$0xff]  }
  0x93   :  { %500 = vmatprep.subr.bf16.mxu0 %v1166_v26  ;;  %v1194_v26 = vld [vmem:[#allocation14 + $0x28] sm:$0xff]  }
  0x96   :  { %501 = vmatpush1.bf16.msra.mxu0 %v1164_v27  ;;  %v1195_v27 = vld [vmem:[#allocation14 + $0x20] sm:$0xff]  }
  0x97   :  { %502 = vmatprep.subr.bf16.mxu0 %v1169_v28  ;;  %v1196_v28 = vld [vmem:[#allocation14 + $0x18] sm:$0xff]  }
  0x9a   :  { %503 = vmatpush1.bf16.msra.mxu0 %v1167_v29  ;;  %v1197_v29 = vld [vmem:[#allocation14 + $0x10] sm:$0xff]  }
  0x9b   :  { %504 = vmatprep.subr.bf16.mxu0 %v1172_v30  ;;  %v947_v30 = vld [vmem:[%s1635_s9] ss:$0 sm:$0xff]  ;;  %s1431_s9 = smov [#allocation17]  }
  0x9c   :  { %s896_s30 = sshll.u32 %s1431_s9, 4  ;;  %s897_s30 = int_to_ptr.vmem [resolvable:$true] %s896_s30 }
  0x9d   :  { %s1362_s16 = scalar_lea.vmem %s897_s30, 256  ;;  %p1367_p13 = scmp.lt.s32.totalorder %s897_s30, %s897_s30 }
  0x9e   :  { %505 = vmatpush1.bf16.msra.mxu0 %v1170_v31  ;;  %p1363_p12 = scmp.ne.s32.totalorder %s897_s30, %s1362_s16  ;;  %p1368_p0 = scmp.lt.s32.totalorder %s1362_s16, %s1362_s16 }
  0x9f   :  { %506 = vmatprep.subr.bf16.mxu0 %v1175_v40  ;;  %v956_v40 = vld [vmem:[%s1637_s11] ss:$0 sm:$0xff] }
  0xa0   :  { %p1369_p1 = por %p1368_p0, %p1367_p13 }
  0xa2   :  { %507 = vmatpush1.bf16.msra.mxu0 %v1173_v41  ;;  %p1370_p2 = pnand %p1369_p1, %p1363_p12 }
  0xa3   :  { %1079 = vmatprep.subr.bf16.mxu0 %v1428_v0 }
 0x145   :  { %v263_v33 = vpop.f32.mrf.mxu0 }
 0x146   :  { %v264_v34 = vadd.f32 %v913_v32, %v263_v33 }
 0x147   :  { %v1037_v35 = vpop.f32.mrf.mxu0 }
 0x148   :  { %v269_v36 = vmax.f32 %v264_v34, 0.0 }
 0x149   :  { %v266_v37 = vpop.f32.mrf.mxu0 }
 0x14a   :  { %v270_v38 = vpack.c.bf16 %v269_v36, %v269_v36 }
 0x14b   :  { %v1038_v39 = vpop.f32.mrf.mxu0 }
 0x14c   :  { %1056 = vmatmul.mubr.bf16.vlgmr.msra.gmra.mxu1 %v270_v38  ;;  %v1198_v38 = vld [vmem:[#allocation14 + $0x8] sm:$0xff]   ;;  %v1199_v39 = vld [vmem:[#allocation14] sm:$0xff]  }
 0x14d   :  { %1075 = vmatprep.mubr.msk.bf16.mxu1 %vm1429_vm0, %v1428_v0  ;;  %1060 = vmatpush3.bf16.msra.mxu1 %v1176_v43 }
 0x14e   :  { %1061 = vmatprep.subr.bf16.mxu1 %v1428_v0 }
 0x151   :  { %1062 = vmatpush3.bf16.msra.mxu1 %v1177_v52 }
 0x152   :  { %1063 = vmatprep.subr.bf16.mxu1 %v1428_v0 }
 0x155   :  { %1064 = vmatpush3.bf16.msra.mxu1 %v1178_v53 }
 0x156   :  { %1065 = vmatprep.subr.bf16.mxu1 %v1428_v0 }
 0x159   :  { %1066 = vmatpush3.bf16.msra.mxu1 %v1179_v54 }
 0x15a   :  { %1067 = vmatprep.subr.bf16.mxu1 %v1428_v0 }
 0x15d   :  { %1068 = vmatpush3.bf16.msra.mxu1 %v1180_v55 }
 0x15e   :  { %1069 = vmatprep.subr.bf16.mxu1 %v1428_v0 }
 0x161   :  { %1070 = vmatpush3.bf16.msra.mxu1 %v1181_v56 }
 0x162   :  { %1071 = vmatprep.subr.bf16.mxu1 %v1428_v0 }
 0x165   :  { %1072 = vmatpush3.bf16.msra.mxu1 %v1182_v57 }
 0x166   :  { %1073 = vmatprep.subr.bf16.mxu1 %v1428_v0 }
 0x169   :  { %1074 = vmatpush3.bf16.msra.mxu1 %v1183_v58 }
 0x16a   :  { %1099 = vmatprep.subr.bf16.mxu1 %v1428_v0 }
 0x20c   :  { %v376_v45 = vpop.f32.mrf.mxu1 }
 0x20d   :  { %v377_v46 = vadd.f32 %v922_v44, %v376_v45 }
 0x20e   :  { %v1057_v47 = vpop.f32.mrf.mxu1 }
 0x20f   :  { %v382_v48 = vmax.f32 %v377_v46, 0.0 }
 0x210   :  { %v379_v49 = vpop.f32.mrf.mxu1 }
 0x211   :  { %v383_v50 = vpack.c.bf16 %v382_v48, %v382_v48 }
 0x212   :  { %v1058_v51 = vpop.f32.mrf.mxu1 }
 0x213   :  { %525 = vmatmul.mubr.bf16.vlgmr.msra.gmra.mxu0 %v383_v50 }
 0x214   :  { %1095 = vmatprep.mubr.msk.bf16.mxu0 %vm1429_vm0, %v1428_v0  ;;  %1080 = vmatpush3.bf16.msra.mxu0 %v1184_v59 }
 0x215   :  { %1081 = vmatprep.subr.bf16.mxu0 %v1428_v0 }
 0x218   :  { %1082 = vmatpush3.bf16.msra.mxu0 %v1185_v60 }
 0x219   :  { %1083 = vmatprep.subr.bf16.mxu0 %v1428_v0 }
 0x21c   :  { %1084 = vmatpush3.bf16.msra.mxu0 %v1186_v61 }
 0x21d   :  { %1085 = vmatprep.subr.bf16.mxu0 %v1428_v0 }
 0x220   :  { %1086 = vmatpush3.bf16.msra.mxu0 %v1187_v62 }
 0x221   :  { %1087 = vmatprep.subr.bf16.mxu0 %v1428_v0 }
 0x224   :  { %1088 = vmatpush3.bf16.msra.mxu0 %v1188_v63 }
 0x225   :  { %1089 = vmatprep.subr.bf16.mxu0 %v1428_v0 }
 0x228   :  { %1090 = vmatpush3.bf16.msra.mxu0 %v1189_v1 }
 0x229   :  { %1091 = vmatprep.subr.bf16.mxu0 %v1428_v0 }
 0x22c   :  { %1092 = vmatpush3.bf16.msra.mxu0 %v1190_v22 }
 0x22d   :  { %1093 = vmatprep.subr.bf16.mxu0 %v1428_v0 }
 0x230   :  { %1094 = vmatpush3.bf16.msra.mxu0 %v1191_v23 }
 0x2d3   :  { %v526_v9 = vpop.f32.mrf.mxu0 }
 0x2d4   :  { %v527_v10 = vadd.f32 %v526_v9, %v405_v7 }
 0x2d5   :  { %v528_v11 = vpop.f32.mrf.mxu0 }
 0x2d6   :  { %878 = vst [vmem:[#allocation17] sm:$0xff] %v527_v10  ;;  %v529_v12 = vadd.f32 %v528_v11, %v409_v8 }
 0x2d7   :  { %v530_v13 = vpop.f32.mrf.mxu0 }
 0x2d8   :  { %v534_v14 = vmul.f32 0.5, %v529_v12  ;;  %879 = vst [vmem:[#allocation17 + $0x8] sm:$0xff] %v529_v12 }
 0x2d9   :  { %v531_v15 = vpop.f32.mrf.mxu0 }
 0x2da   :  { %v535_v16 = vmul.f32 1.442695, %v534_v14 }
 0x2dc   :  { %1200 = vpow2.f32 %v535_v16 }
 0x2e9   :  { %v1201_v18 = vpop.eup %1200 }
 0x2ea   :  { %v537_v19 = vmul.f32 %v1201_v18, %v533_v17 }
 0x2ec   :  { %v538_v20 = vadd.f32 %v537_v19, %v527_v10 }
 0x2ee   :  { %v539_v21 = vpack.c.bf16 %v538_v20, %v538_v20 }
 0x2f0   :  { %1076 = vmatmul.mubr.bf16.vlgmr.msra.gmra.mxu1 %v539_v21 }
 0x2f1   :  { %1115 = vmatprep.mubr.msk.bf16.mxu1 %vm1429_vm0, %v1428_v0  ;;  %1100 = vmatpush3.bf16.msra.mxu1 %v1192_v24 }
 0x2f2   :  { %1101 = vmatprep.subr.bf16.mxu1 %v1428_v0 }
 0x2f5   :  { %1102 = vmatpush3.bf16.msra.mxu1 %v1193_v25 }
 0x2f6   :  { %1103 = vmatprep.subr.bf16.mxu1 %v1428_v0 }
 0x2f9   :  { %1104 = vmatpush3.bf16.msra.mxu1 %v1194_v26 }
 0x2fa   :  { %1105 = vmatprep.subr.bf16.mxu1 %v1428_v0 }
 0x2fd   :  { %1106 = vmatpush3.bf16.msra.mxu1 %v1195_v27 }
 0x2fe   :  { %1107 = vmatprep.subr.bf16.mxu1 %v1428_v0 }
 0x301   :  { %1108 = vmatpush3.bf16.msra.mxu1 %v1196_v28 }
 0x302   :  { %1109 = vmatprep.subr.bf16.mxu1 %v1428_v0 }
 0x305   :  { %1110 = vmatpush3.bf16.msra.mxu1 %v1197_v29 }
 0x306   :  { %1111 = vmatprep.subr.bf16.mxu1 %v1428_v0 }
 0x309   :  { %1112 = vmatpush3.bf16.msra.mxu1 %v1198_v38 }
 0x30a   :  { %1113 = vmatprep.subr.bf16.mxu1 %v1428_v0 }
 0x30d   :  { %1114 = vmatpush3.bf16.msra.mxu1 %v1199_v39 }
 0x3b0   :  { %v645_v31 = vpop.f32.mrf.mxu1 }
 0x3b1   :  { %v646_v32 = vadd.f32 %v947_v30, %v645_v31 }
 0x3b2   :  { %v1077_v33 = vpop.f32.mrf.mxu1 }
 0x3b3   :  { %v651_v34 = vmax.f32 %v646_v32, 0.0 }
 0x3b4   :  { %v648_v35 = vpop.f32.mrf.mxu1 }
 0x3b5   :  { %v652_v36 = vpack.c.bf16 %v651_v34, %v651_v34 }
 0x3b6   :  { %v1078_v37 = vpop.f32.mrf.mxu1 }
 0x3b7   :  { %1096 = vmatmul.mubr.bf16.vlgmr.msra.gmra.mxu0 %v652_v36 }
 0x477   :  { %v758_v41 = vpop.f32.mrf.mxu0 }
 0x478   :  { %v759_v42 = vadd.f32 %v956_v40, %v758_v41 }
 0x479   :  { %v1097_v43 = vpop.f32.mrf.mxu0 }
 0x47a   :  { %v764_v44 = vmax.f32 %v759_v42, 0.0 }
 0x47b   :  { %v761_v45 = vpop.f32.mrf.mxu0 }
 0x47c   :  { %v765_v46 = vpack.c.bf16 %v764_v44, %v764_v44 }
 0x47d   :  { %v1098_v47 = vpop.f32.mrf.mxu0 }
 0x47e   :  { %1116 = vmatmul.mubr.bf16.vlgmr.msra.gmra.mxu1 %v765_v46 }
 0x47f   :  { %1373 = shalt.err (!%p1370_p2)
}
 0x480   :  { %899 = dma.vmem_to_hbm [thread:$0]  %s897_s30, 256, %s1641_s15, [#allocation18]   ;;  %v965_v0 = vld [vmem:[%s1639_s13] ss:$0 sm:$0xff] }
 0x481   :  { %s1432_s18 = smov [#allocation16]  }
 0x482   :  { %s886_s19 = sshll.u32 %s1432_s18, 4  ;;  %s887_s19 = int_to_ptr.vmem [resolvable:$true] %s886_s19 }
 0x483   :  { %s1382_s20 = scalar_lea.vmem %s887_s19, 128  ;;  %p1387_p4 = scmp.lt.s32.totalorder %s887_s19, %s887_s19 }
 0x484   :  { %p1383_p3 = scmp.ne.s32.totalorder %s887_s19, %s1382_s20  ;;  %p1388_p5 = scmp.lt.s32.totalorder %s1382_s20, %s1382_s20 }
 0x486   :  { %p1389_p6 = por %p1388_p5, %p1387_p4 }
 0x488   :  { %p1390_p7 = pnand %p1389_p6, %p1383_p3 }
 0x53e   :  { %v871_v48 = vpop.f32.mrf.mxu1 }
 0x53f   :  { %v872_v49 = vadd.f32 %v965_v0, %v871_v48 }
 0x540   :  { %v1117_v50 = vpop.f32.mrf.mxu1 }
 0x541   :  { %877 = vst [vmem:[#allocation16] sm:$0xff] %v872_v49 }
 0x542   :  { %v874_v51 = vpop.f32.mrf.mxu1 }
 0x543   :  { %1393 = shalt.err (!%p1390_p7)
}
 0x544   :  { %889 = dma.vmem_to_hbm [thread:$0]  %s887_s19, 128, %s1640_s14, [#allocation4]   ;;  %v1118_v52 = vpop.f32.mrf.mxu1 }
 0x545   :  { %1412 = dma.done.wait [#allocation4], 128  }
 0x546   :  { %1413 = vsyncadd [#allocation4], 4294967168 }
 0x547   :  { %1414 = dma.done.wait [#allocation18], 256  }
 0x548   :  { %1415 = vsyncadd [#allocation18], 4294967040 }
 0x549   :  { %906 = vsyncpa [#allocation3], 1 }
 0x54a   :  { %907 = vsyncpa [#allocation6], 1 }
 0x54b   :  { %908 = vsyncpa [#allocation9], 1 }
 0x54c   :  { %909 = vsyncpa [#allocation12], 1 }
 0x54d   :  { %910 = vsyncpa [#allocation15], 1 }
 0x54e   :  { %911 = vsyncpa [#allocation4], 1 }
 0x54f   :  { %912 = vsyncpa [#allocation18], 1 }

</bundles_post_ra>
